<compile_context>
chip_gen: v5e
topology: v5e:2x2
jax: 0.10.0
libtpu: 0.0.40
codegen_flags: <defaults>
</compile_context>

<pallas_src>
import functools

import jax
import jax.numpy as jnp
from jax.experimental import pallas as pl
from jax.experimental.pallas import tpu as pltpu


def ln_temconv_kernel(x_ref, w1_ref, b1t_ref, w2_ref, b2_ref, out_ref, y_ref,
                      *, cs):
    # x_ref:   (Nb, T*CS + pad)  bf16   flattened stimulus rows
    # w1_ref:  (K1p, H)          bf16   conv1 weights, (f, c, s) row order, zero-padded
    # b1t_ref: (1, W1*H)         f32    conv1 bias tiled over windows
    # w2_ref:  (W1*H, Dp)        bf16   conv2 weights flattened (w, h), lane-padded
    # b2_ref:  (1, Dp)           f32
    # out_ref: (Nb, Dp)          f32
    # y_ref:   (Nb, W1*H)        f32    VMEM scratch (conv1 pre-activation)
    k1p, h = w1_ref.shape
    n_win = y_ref.shape[1] // h

    x = x_ref[...]                      # (Nb, Kin) bf16
    w1 = w1_ref[...]                    # (K1p, H)  bf16

    # conv1: one MXU matmul per temporal window, written directly into the
    # lane-major (Nb, W1*H) buffer (no reshapes / transposes needed later).
    for w in range(n_win):
        xs = x[:, w * cs: w * cs + k1p]                     # (Nb, K1p) static slice
        y_ref[:, w * h:(w + 1) * h] = jnp.dot(
            xs, w1, preferred_element_type=jnp.float32)     # (Nb, H) f32

    # bias + numerically-stable softplus, in f32, on the full lane-dense buffer.
    y = y_ref[...] + b1t_ref[...]
    y = jnp.maximum(y, 0.0) + jnp.log1p(jnp.exp(-jnp.abs(y)))

    # conv2 fused with its full (w, h) reduction: a single K = W1*H matmul.
    z = jnp.dot(y.astype(jnp.bfloat16), w2_ref[...],
                preferred_element_type=jnp.float32) + b2_ref[...]
    out_ref[...] = jnp.tanh(z)


@functools.partial(jax.jit, static_argnames=("temp_filter_size",))
def ln_temconv_forward(x, w1, b1, w2, b2, temp_filter_size=15):
    """x: (N, C, S, T) float32 (NCHW).  Returns (N, D_out) float32."""
    N, C, S, T = x.shape
    F = temp_filter_size
    CS = C * S
    W1 = T - F + 1
    H = w1.shape[0]
    D_out = w2.shape[0]

    K1 = CS * F
    K1p = ((K1 + 127) // 128) * 128          # pad contraction dim to 128 multiple
    Dp = ((D_out + 127) // 128) * 128        # lane-dense output width

    # --- wrapper glue (no data duplication) ---
    # x -> (N, T, C*S) -> (N, T*C*S); pad K1p-K1 trailing zero lanes so every
    # window slice [w*CS, w*CS + K1p) stays in range.
    x_t = jnp.transpose(x.reshape(N, CS, T), (0, 2, 1)).reshape(N, T * CS)
    x_t = jnp.pad(x_t, ((0, 0), (0, K1p - K1))).astype(jnp.bfloat16)
    Kin = T * CS + (K1p - K1)

    # conv1 weights: (H, C, S, F) -> (F, C, S, H) -> (F*C*S, H), zero-pad rows.
    w1k = jnp.transpose(w1, (3, 1, 2, 0)).reshape(K1, H)
    w1k = jnp.pad(w1k, ((0, K1p - K1), (0, 0))).astype(jnp.bfloat16)

    # conv1 bias tiled across windows: b1t[0, w*H + h] = b1[h].
    b1t = jnp.tile(b1, W1).reshape(1, W1 * H).astype(jnp.float32)

    # conv2 weights: (D_out, H, 1, W1) -> (W1, H, D_out) -> (W1*H, D_out),
    # lane-padded to Dp so the output store is lane-dense.
    w2f = jnp.transpose(w2[:, :, 0, :], (2, 1, 0)).reshape(W1 * H, D_out)
    w2f = jnp.pad(w2f, ((0, 0), (0, Dp - D_out))).astype(jnp.bfloat16)
    b2p = jnp.pad(b2.reshape(1, D_out), ((0, 0), (0, Dp - D_out))).astype(jnp.float32)

    # Batch tiling: whole batch if small, else 256-row blocks (multiple of 8).
    Nb = N if N <= 256 else 256
    grid = (pl.cdiv(N, Nb),)

    out = pl.pallas_call(
        functools.partial(ln_temconv_kernel, cs=CS),
        out_shape=jax.ShapeDtypeStruct((N, Dp), jnp.float32),
        grid=grid,
        in_specs=[
            pl.BlockSpec((Nb, Kin), lambda i: (i, 0)),      # x tile (pipelined)
            pl.BlockSpec((K1p, H), lambda i: (0, 0)),        # resident weights
            pl.BlockSpec((1, W1 * H), lambda i: (0, 0)),
            pl.BlockSpec((W1 * H, Dp), lambda i: (0, 0)),
            pl.BlockSpec((1, Dp), lambda i: (0, 0)),
        ],
        out_specs=pl.BlockSpec((Nb, Dp), lambda i: (i, 0)),
        scratch_shapes=[pltpu.VMEM((Nb, W1 * H), jnp.float32)],
        compiler_params=pltpu.CompilerParams(
            dimension_semantics=("parallel",),               # shards batch on v7x's 2 TCs
            vmem_limit_bytes=32 * 1024 * 1024),
    )(x_t, w1k, b1t, w2f, b2p)

    return out[:, :D_out]


def ln_temconv_reference(x, w1, b1, w2, b2):
    """Pure-JAX f32 reference reproducing the PyTorch forward pass."""
    y = jax.lax.conv_general_dilated(
        x, w1, window_strides=(1, 1), padding="VALID",
        dimension_numbers=("NCHW", "OIHW", "NCHW"))
    y = y + b1[None, :, None, None]
    y = jax.nn.softplus(y)
    z = jax.lax.conv_general_dilated(
        y, w2, window_strides=(1, 1), padding="VALID",
        dimension_numbers=("NCHW", "OIHW", "NCHW"))
    z = z + b2[None, :, None, None]
    assert z.shape[2] == 1 and z.shape[3] == 1
    return jnp.tanh(z.reshape(z.shape[0], -1))


if __name__ == "__main__":
    # Module config (small shapes): D_stim = (C, S, T).
    N, C, S, T = 2, 2, 8, 22
    F = 15                     # temp_filter_size (default)
    H = 16
    D_out = 4
    W1 = T - F + 1             # conv1 output width; conv2 kernel = (1, W1)

    key = jax.random.PRNGKey(0)
    kx, k1w, k1b, k2w, k2b = jax.random.split(key, 5)

    x = jax.random.normal(kx, (N, C, S, T), dtype=jnp.float32)

    # PyTorch-style uniform init in +/- 1/sqrt(fan_in).
    fan1 = C * S * F
    bound1 = 1.0 / jnp.sqrt(fan1)
    w1 = jax.random.uniform(k1w, (H, C, S, F), jnp.float32, -bound1, bound1)
    b1 = jax.random.uniform(k1b, (H,), jnp.float32, -bound1, bound1)

    fan2 = H * 1 * W1
    bound2 = 1.0 / jnp.sqrt(fan2)
    w2 = jax.random.uniform(k2w, (D_out, H, 1, W1), jnp.float32, -bound2, bound2)
    b2 = jax.random.uniform(k2b, (D_out,), jnp.float32, -bound2, bound2)

    out = ln_temconv_forward(x, w1, b1, w2, b2, temp_filter_size=F)
    out = jax.block_until_ready(out)

    ref = jax.block_until_ready(ln_temconv_reference(x, w1, b1, w2, b2))
    assert out.shape == (N, D_out), out.shape
    # bf16 MXU operands vs f32 reference -> relaxed tolerance.
    assert jnp.allclose(out, ref, atol=2e-2, rtol=2e-2), (out, ref)

    print("KERNEL_OK")
</pallas_src>

<mosaic_0001>
module attributes {stable_mosaic.version = 11 : i64} {
  func.func @ln_temconv_kernel(%arg0: i32, %arg1: memref<2x368xbf16, #tpu.memory_space<vmem>>, %arg2: memref<256x16xbf16, #tpu.memory_space<vmem>>, %arg3: memref<1x128xf32, #tpu.memory_space<vmem>>, %arg4: memref<128x128xbf16, #tpu.memory_space<vmem>>, %arg5: memref<1x128xf32, #tpu.memory_space<vmem>>, %arg6: memref<2x128xf32, #tpu.memory_space<vmem>>, %arg7: memref<2x128xf32, #tpu.memory_space<vmem>>) attributes {dimension_semantics = [#tpu.dimension_semantics<parallel>], iteration_bounds = array<i64: 1>, scalar_prefetch = 0 : i64, scratch_operands = 1 : i64, tpu.core_type = #tpu.core_type<tc>, window_params = [{transform_indices = @transform_0, window_bounds = array<i64: 2, 368>}, {pipeline_mode = #tpu.pipeline_mode<synchronous>, transform_indices = @transform_1, window_bounds = array<i64: 256, 16>}, {pipeline_mode = #tpu.pipeline_mode<synchronous>, transform_indices = @transform_2, window_bounds = array<i64: 1, 128>}, {pipeline_mode = #tpu.pipeline_mode<synchronous>, transform_indices = @transform_3, window_bounds = array<i64: 128, 128>}, {pipeline_mode = #tpu.pipeline_mode<synchronous>, transform_indices = @transform_4, window_bounds = array<i64: 1, 128>}, {transform_indices = @transform_5, window_bounds = array<i64: 2, 128>}]} {
    %c0 = arith.constant 0 : index
    %c0_0 = arith.constant 0 : index
    %0 = vector.load %arg1[%c0, %c0_0] : memref<2x368xbf16, #tpu.memory_space<vmem>>, vector<2x368xbf16>
    %c0_1 = arith.constant 0 : index
    %c0_2 = arith.constant 0 : index
    %1 = vector.load %arg2[%c0_1, %c0_2] : memref<256x16xbf16, #tpu.memory_space<vmem>>, vector<256x16xbf16>
    %2 = vector.extract_strided_slice %0 {offsets = [0, 0], sizes = [2, 256], strides = [1, 1]} : vector<2x368xbf16> to vector<2x256xbf16>
    %cst = arith.constant dense<0.000000e+00> : vector<2x16xf32>
    %3 = tpu.matmul %2, %1, %cst {dimension_numbers = #tpu.dot_dimension_numbers<[1], [0], [0], [1], [0, 0, 1, 1], [], []>} : vector<2x256xbf16>, vector<256x16xbf16>, vector<2x16xf32> -> vector<2x16xf32>
    %c0_3 = arith.constant 0 : index
    %c0_4 = arith.constant 0 : index
    %4 = vector.load %arg7[%c0_3, %c0_4] : memref<2x128xf32, #tpu.memory_space<vmem>>, vector<2x16xf32>
    tpu.vector_store %arg7[%c0_3, %c0_4], %3 {strides = array<i32>} : memref<2x128xf32, #tpu.memory_space<vmem>>, vector<2x16xf32>,
    %5 = vector.extract_strided_slice %0 {offsets = [0, 16], sizes = [2, 256], strides = [1, 1]} : vector<2x368xbf16> to vector<2x256xbf16>
    %cst_5 = arith.constant dense<0.000000e+00> : vector<2x16xf32>
    %6 = tpu.matmul %5, %1, %cst_5 {dimension_numbers = #tpu.dot_dimension_numbers<[1], [0], [0], [1], [0, 0, 1, 1], [], []>} : vector<2x256xbf16>, vector<256x16xbf16>, vector<2x16xf32> -> vector<2x16xf32>
    %c0_6 = arith.constant 0 : index
    %c16 = arith.constant 16 : index
    %7 = vector.load %arg7[%c0_6, %c16] : memref<2x128xf32, #tpu.memory_space<vmem>>, vector<2x16xf32>
    tpu.vector_store %arg7[%c0_6, %c16], %6 {strides = array<i32>} : memref<2x128xf32, #tpu.memory_space<vmem>>, vector<2x16xf32>,
    %8 = vector.extract_strided_slice %0 {offsets = [0, 32], sizes = [2, 256], strides = [1, 1]} : vector<2x368xbf16> to vector<2x256xbf16>
    %cst_7 = arith.constant dense<0.000000e+00> : vector<2x16xf32>
    %9 = tpu.matmul %8, %1, %cst_7 {dimension_numbers = #tpu.dot_dimension_numbers<[1], [0], [0], [1], [0, 0, 1, 1], [], []>} : vector<2x256xbf16>, vector<256x16xbf16>, vector<2x16xf32> -> vector<2x16xf32>
    %c0_8 = arith.constant 0 : index
    %c32 = arith.constant 32 : index
    %10 = vector.load %arg7[%c0_8, %c32] : memref<2x128xf32, #tpu.memory_space<vmem>>, vector<2x16xf32>
    tpu.vector_store %arg7[%c0_8, %c32], %9 {strides = array<i32>} : memref<2x128xf32, #tpu.memory_space<vmem>>, vector<2x16xf32>,
    %11 = vector.extract_strided_slice %0 {offsets = [0, 48], sizes = [2, 256], strides = [1, 1]} : vector<2x368xbf16> to vector<2x256xbf16>
    %cst_9 = arith.constant dense<0.000000e+00> : vector<2x16xf32>
    %12 = tpu.matmul %11, %1, %cst_9 {dimension_numbers = #tpu.dot_dimension_numbers<[1], [0], [0], [1], [0, 0, 1, 1], [], []>} : vector<2x256xbf16>, vector<256x16xbf16>, vector<2x16xf32> -> vector<2x16xf32>
    %c0_10 = arith.constant 0 : index
    %c48 = arith.constant 48 : index
    %13 = vector.load %arg7[%c0_10, %c48] : memref<2x128xf32, #tpu.memory_space<vmem>>, vector<2x16xf32>
    tpu.vector_store %arg7[%c0_10, %c48], %12 {strides = array<i32>} : memref<2x128xf32, #tpu.memory_space<vmem>>, vector<2x16xf32>,
    %14 = vector.extract_strided_slice %0 {offsets = [0, 64], sizes = [2, 256], strides = [1, 1]} : vector<2x368xbf16> to vector<2x256xbf16>
    %cst_11 = arith.constant dense<0.000000e+00> : vector<2x16xf32>
    %15 = tpu.matmul %14, %1, %cst_11 {dimension_numbers = #tpu.dot_dimension_numbers<[1], [0], [0], [1], [0, 0, 1, 1], [], []>} : vector<2x256xbf16>, vector<256x16xbf16>, vector<2x16xf32> -> vector<2x16xf32>
    %c0_12 = arith.constant 0 : index
    %c64 = arith.constant 64 : index
    %16 = vector.load %arg7[%c0_12, %c64] : memref<2x128xf32, #tpu.memory_space<vmem>>, vector<2x16xf32>
    tpu.vector_store %arg7[%c0_12, %c64], %15 {strides = array<i32>} : memref<2x128xf32, #tpu.memory_space<vmem>>, vector<2x16xf32>,
    %17 = vector.extract_strided_slice %0 {offsets = [0, 80], sizes = [2, 256], strides = [1, 1]} : vector<2x368xbf16> to vector<2x256xbf16>
    %cst_13 = arith.constant dense<0.000000e+00> : vector<2x16xf32>
    %18 = tpu.matmul %17, %1, %cst_13 {dimension_numbers = #tpu.dot_dimension_numbers<[1], [0], [0], [1], [0, 0, 1, 1], [], []>} : vector<2x256xbf16>, vector<256x16xbf16>, vector<2x16xf32> -> vector<2x16xf32>
    %c0_14 = arith.constant 0 : index
    %c80 = arith.constant 80 : index
    %19 = vector.load %arg7[%c0_14, %c80] : memref<2x128xf32, #tpu.memory_space<vmem>>, vector<2x16xf32>
    tpu.vector_store %arg7[%c0_14, %c80], %18 {strides = array<i32>} : memref<2x128xf32, #tpu.memory_space<vmem>>, vector<2x16xf32>,
    %20 = vector.extract_strided_slice %0 {offsets = [0, 96], sizes = [2, 256], strides = [1, 1]} : vector<2x368xbf16> to vector<2x256xbf16>
    %cst_15 = arith.constant dense<0.000000e+00> : vector<2x16xf32>
    %21 = tpu.matmul %20, %1, %cst_15 {dimension_numbers = #tpu.dot_dimension_numbers<[1], [0], [0], [1], [0, 0, 1, 1], [], []>} : vector<2x256xbf16>, vector<256x16xbf16>, vector<2x16xf32> -> vector<2x16xf32>
    %c0_16 = arith.constant 0 : index
    %c96 = arith.constant 96 : index
    %22 = vector.load %arg7[%c0_16, %c96] : memref<2x128xf32, #tpu.memory_space<vmem>>, vector<2x16xf32>
    tpu.vector_store %arg7[%c0_16, %c96], %21 {strides = array<i32>} : memref<2x128xf32, #tpu.memory_space<vmem>>, vector<2x16xf32>,
    %23 = vector.extract_strided_slice %0 {offsets = [0, 112], sizes = [2, 256], strides = [1, 1]} : vector<2x368xbf16> to vector<2x256xbf16>
    %cst_17 = arith.constant dense<0.000000e+00> : vector<2x16xf32>
    %24 = tpu.matmul %23, %1, %cst_17 {dimension_numbers = #tpu.dot_dimension_numbers<[1], [0], [0], [1], [0, 0, 1, 1], [], []>} : vector<2x256xbf16>, vector<256x16xbf16>, vector<2x16xf32> -> vector<2x16xf32>
    %c0_18 = arith.constant 0 : index
    %c112 = arith.constant 112 : index
    %25 = vector.load %arg7[%c0_18, %c112] : memref<2x128xf32, #tpu.memory_space<vmem>>, vector<2x16xf32>
    tpu.vector_store %arg7[%c0_18, %c112], %24 {strides = array<i32>} : memref<2x128xf32, #tpu.memory_space<vmem>>, vector<2x16xf32>,
    %c0_19 = arith.constant 0 : index
    %c0_20 = arith.constant 0 : index
    %26 = vector.load %arg7[%c0_19, %c0_20] : memref<2x128xf32, #tpu.memory_space<vmem>>, vector<2x128xf32>
    %c0_21 = arith.constant 0 : index
    %c0_22 = arith.constant 0 : index
    %27 = vector.load %arg3[%c0_21, %c0_22] : memref<1x128xf32, #tpu.memory_space<vmem>>, vector<1x128xf32>
    %28 = vector.broadcast %27 : vector<1x128xf32> to vector<2x128xf32>
    %29 = arith.addf %26, %28 : vector<2x128xf32>
    %cst_23 = arith.constant 0.000000e+00 : f32
    %30 = vector.broadcast %cst_23 : f32 to vector<2x128xf32>
    %31 = arith.maximumf %29, %30 : vector<2x128xf32>
    %32 = math.absf %29 : vector<2x128xf32>
    %cst_24 = arith.constant 0.000000e+00 : f32
    %33 = vector.broadcast %cst_24 : f32 to vector<2x128xf32>
    %34 = arith.subf %33, %32 : vector<2x128xf32>
    %35 = math.exp %34 : vector<2x128xf32>
    %36 = math.log1p %35 : vector<2x128xf32>
    %37 = arith.addf %31, %36 : vector<2x128xf32>
    %38 = arith.truncf %37 : vector<2x128xf32> to vector<2x128xbf16>
    %c0_25 = arith.constant 0 : index
    %c0_26 = arith.constant 0 : index
    %39 = vector.load %arg4[%c0_25, %c0_26] : memref<128x128xbf16, #tpu.memory_space<vmem>>, vector<128x128xbf16>
    %cst_27 = arith.constant dense<0.000000e+00> : vector<2x128xf32>
    %40 = tpu.matmul %38, %39, %cst_27 {dimension_numbers = #tpu.dot_dimension_numbers<[1], [0], [0], [1], [0, 0, 1, 1], [], []>} : vector<2x128xbf16>, vector<128x128xbf16>, vector<2x128xf32> -> vector<2x128xf32>
    %c0_28 = arith.constant 0 : index
    %c0_29 = arith.constant 0 : index
    %41 = vector.load %arg5[%c0_28, %c0_29] : memref<1x128xf32, #tpu.memory_space<vmem>>, vector<1x128xf32>
    %42 = vector.broadcast %41 : vector<1x128xf32> to vector<2x128xf32>
    %43 = arith.addf %40, %42 : vector<2x128xf32>
    %44 = math.tanh %43 : vector<2x128xf32>
    %c0_30 = arith.constant 0 : index
    %c0_31 = arith.constant 0 : index
    %45 = vector.load %arg6[%c0_30, %c0_31] : memref<2x128xf32, #tpu.memory_space<vmem>>, vector<2x128xf32>
    tpu.vector_store %arg6[%c0_30, %c0_31], %44 {strides = array<i32>} : memref<2x128xf32, #tpu.memory_space<vmem>>, vector<2x128xf32>,
    return
  }
  func.func @transform_0(%arg0: i32) -> (i32, i32) {
    %c0_i32 = arith.constant 0 : i32
    %c0_i32_0 = arith.constant 0 : i32
    return %arg0, %c0_i32 : i32, i32
  }
  func.func @transform_1(%arg0: i32) -> (i32, i32) {
    %c0_i32 = arith.constant 0 : i32
    %c0_i32_0 = arith.constant 0 : i32
    %c0_i32_1 = arith.constant 0 : i32
    return %c0_i32, %c0_i32_0 : i32, i32
  }
  func.func @transform_2(%arg0: i32) -> (i32, i32) {
    %c0_i32 = arith.constant 0 : i32
    %c0_i32_0 = arith.constant 0 : i32
    %c0_i32_1 = arith.constant 0 : i32
    return %c0_i32, %c0_i32_0 : i32, i32
  }
  func.func @transform_3(%arg0: i32) -> (i32, i32) {
    %c0_i32 = arith.constant 0 : i32
    %c0_i32_0 = arith.constant 0 : i32
    %c0_i32_1 = arith.constant 0 : i32
    return %c0_i32, %c0_i32_0 : i32, i32
  }
  func.func @transform_4(%arg0: i32) -> (i32, i32) {
    %c0_i32 = arith.constant 0 : i32
    %c0_i32_0 = arith.constant 0 : i32
    %c0_i32_1 = arith.constant 0 : i32
    return %c0_i32, %c0_i32_0 : i32, i32
  }
  func.func @transform_5(%arg0: i32) -> (i32, i32) {
    %c0_i32 = arith.constant 0 : i32
    %c0_i32_0 = arith.constant 0 : i32
    return %arg0, %c0_i32 : i32, i32
  }
}

</mosaic_0001>

<bundles_post_ra>
// kernel: tile.8
= control target key start
LH: loop header
LB: loop body
LE: loop exit
PB: predicated region body
PF: predicated region fallthrough
CT: control target
= control target key end

     0   :  { %s22_s0 = inlined_call_operand.vmem [shape: f32[16], index: 0, kind: input, shape index: {}]   ;;  %s23_s1 = inlined_call_operand.vmem [shape: f32[8,16], index: 1, kind: output, shape index: {}]  }
   0x1   :  { %v4_v0 = vld [vmem:[%s22_s0] ss:$0 sm:$0xff] }
   0x2   :  { %5 = vst [vmem:[%s23_s1] sm:$0xff] %v4_v0 }

// kernel: tile.9
= control target key start
LH: loop header
LB: loop body
LE: loop exit
PB: predicated region body
PF: predicated region fallthrough
CT: control target
= control target key end

     0   :  { %s67_s10 = smov 112   ;;  %s68_s11 = smov 80   ;;  %vm3_vm0 = vcmask 130048   ;;  %vm9_vm1 = vcmask 1048448   ;;  %vm15_vm2 = vcmask 917248   ;;  %vm21_vm3 = vcmask 786048   ;;  %s111_s0 = inlined_call_operand.vmem [shape: f32[8,16], index: 0, kind: input, shape index: {}]   ;;  %s112_s1 = inlined_call_operand.vmem [shape: f32[1,128], index: 1, kind: output, shape index: {}]  }
   0x1   :  { %v53_v0 = vld [vmem:[%s111_s0 + $0x7] sm:$0x1]   ;;  %v55_v1 = vld [vmem:[%s111_s0 + $0x5] sm:$0x1]   ;;  %v57_v2 = vld [vmem:[%s111_s0 + $0x3] sm:$0x1]  }
   0x2   :  { %7 = vrot.lane.b32.xlu0 %v53_v0, %s67_s10  ;;  %19 = vrot.lane.b32.xlu1 %v55_v1, %s68_s11  ;;  %s69_s14 = smov 48   ;;  %v54_v3 = vld [vmem:[%s111_s0 + $0x6] sm:$0x1]   ;;  %v56_v4 = vld [vmem:[%s111_s0 + $0x4] sm:$0x1]   ;;  %s70_s21 = smov 96  }
   0x3   :  { %31 = vrot.lane.b32.xlu2 %v57_v2, %s69_s14  ;;  %v58_v5 = vld [vmem:[%s111_s0 + $0x2] sm:$0x1]   ;;  %s71_s22 = smov 64   ;;  %s72_s23 = smov 32   ;;  %v59_v6 = vld [vmem:[%s111_s0 + $0x1] sm:$0x1]  }
   0x4   :  { %s73_s26 = smov 16   ;;  %v2_v7 = vld [vmem:[%s111_s0] sm:$0x1]   ;;  %vm27_vm4 = vcmask 654848   ;;  %vm33_vm5 = vcmask 523648   ;;  %vm39_vm6 = vcmask 392448  }
   0x5   :  { %4 = vst.msk [vmem:[#allocation0] sm:$0x1] %vm3_vm0, %v2_v7   ;;  %vm45_vm7 = vcmask 261248  }
   0xa   :  { %13 = vrot.lane.b32.xlu0 %v54_v3, %s70_s21  ;;  %25 = vrot.lane.b32.xlu1 %v56_v4, %s71_s22 }
   0xb   :  { %37 = vrot.lane.b32.xlu2 %v58_v5, %s72_s23 }
  0x12   :  { %43 = vrot.lane.b32.xlu0 %v59_v6, %s73_s26 }
  0x5d   :  { %v32_v8 = vpop.permute.xlu2 %31  }
  0x65   :  { %v38_v9 = vpop.permute.xlu2 %37  }
  0x74   :  { %v8_v10 = vpop.permute.xlu0 %7   ;;  %v20_v11 = vpop.permute.xlu1 %19  }
  0x75   :  { %10 = vst.msk [vmem:[#allocation0] sm:$0x1] %vm9_vm1, %v8_v10  }
  0x7c   :  { %v14_v12 = vpop.permute.xlu0 %13   ;;  %v26_v13 = vpop.permute.xlu1 %25  }
  0x7d   :  { %16 = vst.msk [vmem:[#allocation0] sm:$0x1] %vm15_vm2, %v14_v12  }
  0x7e   :  { %22 = vst.msk [vmem:[#allocation0] sm:$0x1] %vm21_vm3, %v20_v11  }
  0x7f   :  { %28 = vst.msk [vmem:[#allocation0] sm:$0x1] %vm27_vm4, %v26_v13  }
  0x80   :  { %34 = vst.msk [vmem:[#allocation0] sm:$0x1] %vm33_vm5, %v32_v8  }
  0x81   :  { %40 = vst.msk [vmem:[#allocation0] sm:$0x1] %vm39_vm6, %v38_v9  }
  0x84   :  { %v44_v14 = vpop.permute.xlu0 %43  }
  0x85   :  { %46 = vst.msk [vmem:[#allocation0] sm:$0x1] %vm45_vm7, %v44_v14  }
  0x8c   :  { %v49_v15 = vld [vmem:[#allocation0] sm:$0x1] }
  0x8d   :  { %52 = vst [vmem:[%s112_s1] sm:$0x1] %v49_v15 }

// kernel: ln_temconv_forward.1
= control target key start
LH: loop header
LB: loop body
LE: loop exit
PB: predicated region body
PF: predicated region fallthrough
CT: control target
= control target key end

     0   :  { %s1143_s0 = inlined_call_operand.vmem [shape: bf16[2,368], index: 0, kind: input, shape index: {}]   ;;  %s1144_s1 = inlined_call_operand.vmem [shape: bf16[256,16], index: 1, kind: input, shape index: {}]   ;;  %s1145_s2 = inlined_call_operand.vmem [shape: f32[1,128], index: 2, kind: input, shape index: {}]   ;;  %s1146_s3 = inlined_call_operand.vmem [shape: bf16[128,128], index: 3, kind: input, shape index: {}]   ;;  %s1147_s4 = inlined_call_operand.vmem [shape: f32[1,128], index: 4, kind: input, shape index: {}]   ;;  %s1148_s5 = inlined_call_operand.hbm [shape: f32[2,128], index: 5, kind: output, shape index: {}]  }
   0x1   :  { %v858_v0 = vld [vmem:[%s1143_s0] sm:$0x7] }
   0x2   :  { %55 = vst [vmem:[#allocation1] ss:$9 sm:$0xff] %v858_v0 }
   0x3   :  { %10 = vsyncpa [#allocation4], 0  ;;  %s817_s20 = smov 112   ;;  %v874_v9 = vld [vmem:[%s1144_s1 + $0x38] sm:$0xff]  ;;  %s818_s24 = smov 80   ;;  %v891_v14 = vld [vmem:[%s1144_s1 + $0x30] sm:$0xff] }
   0x4   :  { %v879_v10 = vld [vmem:[%s1144_s1 + $0x78] sm:$0xff]  ;;  %202 = vmatpush.bf16.msra.mxu2 %v874_v9  ;;  %156 = vmatpush.bf16.msra.mxu0 %v874_v9  ;;  %s819_s25 = smov 96   ;;  %v896_v15 = vld [vmem:[%s1144_s1 + $0x70] sm:$0xff]  ;;  %v904_v16 = vld [vmem:[%s1144_s1 + $0x28] sm:$0xff]  ;;  %s820_s21 = smov 48   ;;  %vm197_vm0 = vcmask 916480  }
   0x5   :  { %215 = vmatpush.bf16.msra.mxu3 %v879_v10  ;;  %169 = vmatpush.bf16.msra.mxu1 %v879_v10  ;;  %v909_v17 = vld [vmem:[%s1144_s1 + $0x68] sm:$0xff]  ;;  %v918_v18 = vld [vmem:[%s1144_s1 + $0x20] sm:$0xff]  ;;  %v935_v23 = vld [vmem:[%s1144_s1 + $0x18] sm:$0xff]  ;;  %s821_s7 = smov 64   ;;  %s823_s8 = smov 32   ;;  %vm297_vm1 = vcmask 654336  }
   0x6   :  { %v923_v19 = vld [vmem:[%s1144_s1 + $0x60] sm:$0xff]  ;;  %v940_v24 = vld [vmem:[%s1144_s1 + $0x58] sm:$0xff]  ;;  %v949_v25 = vld [vmem:[%s1144_s1 + $0x10] sm:$0xff]  ;;  %vm247_vm2 = vcmask 785408   ;;  %vm397_vm3 = vcmask 392192   ;;  %vm347_vm4 = vcmask 523264  }
   0x7   :  { %v954_v26 = vld [vmem:[%s1144_s1 + $0x50] sm:$0xff]  ;;  %v967_v30 = vld [vmem:[%s1144_s1 + $0x8] sm:$0xff]  ;;  %v981_v32 = vld [vmem:[%s1144_s1] sm:$0xff]  ;;  %vm447_vm5 = vcmask 261120   ;;  %vm182_vm6 = vcmask 123904   ;;  %vm497_vm7 = vcmask 130048  }
   0x8   :  { %203 = vmatpush.bf16.msra.mxu2 %v891_v14  ;;  %157 = vmatpush.bf16.msra.mxu0 %v891_v14  ;;  %v972_v31 = vld [vmem:[%s1144_s1 + $0x48] sm:$0xff]  ;;  %v986_v33 = vld [vmem:[%s1144_s1 + $0x40] sm:$0xff]  ;;  %s822_s1 = smov 16   ;;  %vm232_vm8 = vcmask 255104   ;;  %vm282_vm9 = vcmask 386304   ;;  %vm332_vm10 = vcmask 517504  }
   0x9   :  { %v861_v1 = vld [vmem:[#allocation1] sm:$0xff]  ;;  %v863_v2 = vld [vmem:[#allocation1 + $0x9] sm:$0xff]  ;;  %216 = vmatpush.bf16.msra.mxu3 %v896_v15  ;;  %170 = vmatpush.bf16.msra.mxu1 %v896_v15  ;;  %vm382_vm11 = vcmask 648704   ;;  %vm432_vm12 = vcmask 779904   ;;  %vm482_vm13 = vcmask 911104   ;;  %vm532_vm14 = vcmask 1042304  }
   0xa   :  { %184 = vst [vmem:[#allocation1] ss:$9 sm:$0xff] %v858_v0  ;;  %s824_s26 = smov [#allocation3]   ;;  %s646_s30 = sshll.u32 %s1148_s5, 4  ;;  %s647_s30 = int_to_ptr.hbm [resolvable:$true] %s646_s30 }
   0xb   :  { %s644_s27 = sshll.u32 %s824_s26, 4  ;;  %s645_s27 = int_to_ptr.vmem [resolvable:$true] %s644_s27 }
   0xc   :  { %204 = vmatpush.bf16.msra.mxu2 %v904_v16  ;;  %158 = vmatpush.bf16.msra.mxu0 %v904_v16 }
   0xd   :  { %217 = vmatpush.bf16.msra.mxu3 %v909_v17  ;;  %171 = vmatpush.bf16.msra.mxu1 %v909_v17 }
  0x10   :  { %205 = vmatpush.bf16.msra.mxu2 %v918_v18  ;;  %159 = vmatpush.bf16.msra.mxu0 %v918_v18 }
  0x11   :  { %v185_v3 = vld [vmem:[#allocation1] sm:$0xff]  ;;  %v189_v4 = vld [vmem:[#allocation1 + $0x12] sm:$0xff]  ;;  %v187_v5 = vld [vmem:[#allocation1 + $0x9] sm:$0xff]  ;;  %218 = vmatpush.bf16.msra.mxu3 %v923_v19  ;;  %172 = vmatpush.bf16.msra.mxu1 %v923_v19 }
  0x12   :  { %191 = vrot.lane.b32.xlu0 %v185_v3, %s817_s20  ;;  %195 = vrot.lane.b32.xlu1 %v189_v4, %s817_s20  ;;  %234 = vst [vmem:[#allocation1] ss:$9 sm:$0xff] %v858_v0 }
  0x14   :  { %206 = vmatpush.bf16.msra.mxu2 %v935_v23  ;;  %160 = vmatpush.bf16.msra.mxu0 %v935_v23 }
  0x15   :  { %219 = vmatpush.bf16.msra.mxu3 %v940_v24  ;;  %173 = vmatpush.bf16.msra.mxu1 %v940_v24 }
  0x18   :  { %207 = vmatpush.bf16.msra.mxu2 %v949_v25  ;;  %161 = vmatpush.bf16.msra.mxu0 %v949_v25 }
  0x19   :  { %v235_v6 = vld [vmem:[#allocation1] sm:$0xff]  ;;  %v237_v7 = vld [vmem:[#allocation1 + $0x9] sm:$0xff]  ;;  %v239_v8 = vld [vmem:[#allocation1 + $0x12] sm:$0xff]  ;;  %220 = vmatpush.bf16.msra.mxu3 %v954_v26  ;;  %174 = vmatpush.bf16.msra.mxu1 %v954_v26 }
  0x1a   :  { %193 = vrot.lane.b32.xlu0 %v187_v5, %s817_s20  ;;  %284 = vst [vmem:[#allocation1] ss:$9 sm:$0xff] %v858_v0 }
  0x1c   :  { %208 = vmatpush.bf16.msra.mxu2 %v967_v30  ;;  %162 = vmatpush.bf16.msra.mxu0 %v967_v30 }
  0x1d   :  { %221 = vmatpush.bf16.msra.mxu3 %v972_v31  ;;  %175 = vmatpush.bf16.msra.mxu1 %v972_v31 }
  0x20   :  { %209 = vmatpush.bf16.msra.mxu2 %v981_v32  ;;  %163 = vmatpush.bf16.msra.mxu0 %v981_v32 }
  0x21   :  { %v285_v11 = vld [vmem:[#allocation1] sm:$0xff]  ;;  %v287_v12 = vld [vmem:[#allocation1 + $0x9] sm:$0xff]  ;;  %v289_v13 = vld [vmem:[#allocation1 + $0x12] sm:$0xff]  ;;  %222 = vmatpush.bf16.msra.mxu3 %v986_v33  ;;  %176 = vmatpush.bf16.msra.mxu1 %v986_v33 }
  0x22   :  { %291 = vrot.lane.b32.xlu1 %v285_v11, %s818_s24  ;;  %241 = vrot.lane.b32.xlu0 %v235_v6, %s819_s25  ;;  %334 = vst [vmem:[#allocation1] ss:$9 sm:$0xff] %v858_v0 }
  0x23   :  { %293 = vrot.lane.b32.xlu2 %v287_v12, %s818_s24  ;;  %164 = vmatmul.bf16.vlgmr.msra.gmra.mxu0 %v861_v1 }
  0x24   :  { %302 = vmatpush.bf16.msrb.mxu2 %v874_v9  ;;  %252 = vmatpush.bf16.msrb.mxu0 %v874_v9 }
  0x25   :  { %315 = vmatpush.bf16.msrb.mxu3 %v879_v10  ;;  %265 = vmatpush.bf16.msrb.mxu1 %v879_v10 }
  0x26   :  { %177 = vmatmul.bf16.vlgmr.msra.gmra.mxu1 %v863_v2 }
  0x28   :  { %303 = vmatpush.bf16.msrb.mxu2 %v891_v14  ;;  %253 = vmatpush.bf16.msrb.mxu0 %v891_v14 }
  0x29   :  { %v335_v20 = vld [vmem:[#allocation1] sm:$0xff]  ;;  %v337_v21 = vld [vmem:[#allocation1 + $0x9] sm:$0xff]  ;;  %v339_v22 = vld [vmem:[#allocation1 + $0x12] sm:$0xff]  ;;  %316 = vmatpush.bf16.msrb.mxu3 %v896_v15  ;;  %266 = vmatpush.bf16.msrb.mxu1 %v896_v15 }
  0x2a   :  { %243 = vrot.lane.b32.xlu1 %v237_v7, %s819_s25  ;;  %384 = vst [vmem:[#allocation1] ss:$9 sm:$0xff] %v858_v0 }
  0x2b   :  { %295 = vrot.lane.b32.xlu2 %v289_v13, %s818_s24 }
  0x2c   :  { %304 = vmatpush.bf16.msrb.mxu2 %v904_v16  ;;  %254 = vmatpush.bf16.msrb.mxu0 %v904_v16 }
  0x2d   :  { %317 = vmatpush.bf16.msrb.mxu3 %v909_v17  ;;  %267 = vmatpush.bf16.msrb.mxu1 %v909_v17 }
  0x30   :  { %305 = vmatpush.bf16.msrb.mxu2 %v918_v18  ;;  %255 = vmatpush.bf16.msrb.mxu0 %v918_v18 }
  0x31   :  { %v387_v27 = vld [vmem:[#allocation1 + $0x9] sm:$0xff]  ;;  %v385_v28 = vld [vmem:[#allocation1] sm:$0xff]  ;;  %v389_v29 = vld [vmem:[#allocation1 + $0x12] sm:$0xff]  ;;  %318 = vmatpush.bf16.msrb.mxu3 %v923_v19  ;;  %268 = vmatpush.bf16.msrb.mxu1 %v923_v19 }
  0x32   :  { %393 = vrot.lane.b32.xlu1 %v387_v27, %s820_s21  ;;  %391 = vrot.lane.b32.xlu0 %v385_v28, %s820_s21  ;;  %434 = vst [vmem:[#allocation1] ss:$9 sm:$0xff] %v858_v0 }
  0x33   :  { %245 = vrot.lane.b32.xlu2 %v239_v8, %s819_s25 }
  0x34   :  { %306 = vmatpush.bf16.msrb.mxu2 %v935_v23  ;;  %256 = vmatpush.bf16.msrb.mxu0 %v935_v23 }
  0x35   :  { %319 = vmatpush.bf16.msrb.mxu3 %v940_v24  ;;  %269 = vmatpush.bf16.msrb.mxu1 %v940_v24 }
  0x38   :  { %307 = vmatpush.bf16.msrb.mxu2 %v949_v25  ;;  %257 = vmatpush.bf16.msrb.mxu0 %v949_v25 }
  0x39   :  { %v435_v34 = vld [vmem:[#allocation1] sm:$0xff]  ;;  %v437_v35 = vld [vmem:[#allocation1 + $0x9] sm:$0xff]  ;;  %v439_v36 = vld [vmem:[#allocation1 + $0x12] sm:$0xff]  ;;  %320 = vmatpush.bf16.msrb.mxu3 %v954_v26  ;;  %270 = vmatpush.bf16.msrb.mxu1 %v954_v26 }
  0x3a   :  { %343 = vrot.lane.b32.xlu1 %v337_v21, %s821_s7  ;;  %341 = vrot.lane.b32.xlu0 %v335_v20, %s821_s7  ;;  %484 = vst [vmem:[#allocation1] ss:$9 sm:$0xff] %v858_v0 }
  0x3b   :  { %395 = vrot.lane.b32.xlu2 %v389_v29, %s820_s21 }
  0x3c   :  { %308 = vmatpush.bf16.msrb.mxu2 %v967_v30  ;;  %258 = vmatpush.bf16.msrb.mxu0 %v967_v30 }
  0x3d   :  { %321 = vmatpush.bf16.msrb.mxu3 %v972_v31  ;;  %271 = vmatpush.bf16.msrb.mxu1 %v972_v31 }
  0x40   :  { %309 = vmatpush.bf16.msrb.mxu2 %v981_v32  ;;  %259 = vmatpush.bf16.msrb.mxu0 %v981_v32 }
  0x41   :  { %v487_v37 = vld [vmem:[#allocation1 + $0x9] sm:$0xff]  ;;  %v485_v38 = vld [vmem:[#allocation1] sm:$0xff]  ;;  %v489_v39 = vld [vmem:[#allocation1 + $0x12] sm:$0xff]  ;;  %322 = vmatpush.bf16.msrb.mxu3 %v986_v33  ;;  %272 = vmatpush.bf16.msrb.mxu1 %v986_v33 }
  0x42   :  { %493 = vrot.lane.b32.xlu1 %v487_v37, %s822_s1  ;;  %491 = vrot.lane.b32.xlu0 %v485_v38, %s822_s1 }
  0x43   :  { %345 = vrot.lane.b32.xlu2 %v339_v22, %s821_s7 }
  0x44   :  { %352 = vmatpush.bf16.msra.mxu0 %v874_v9 }
  0x45   :  { %365 = vmatpush.bf16.msra.mxu1 %v879_v10 }
  0x48   :  { %353 = vmatpush.bf16.msra.mxu0 %v891_v14 }
  0x49   :  { %366 = vmatpush.bf16.msra.mxu1 %v896_v15 }
  0x4a   :  { %443 = vrot.lane.b32.xlu1 %v437_v35, %s823_s8  ;;  %441 = vrot.lane.b32.xlu0 %v435_v34, %s823_s8 }
  0x4b   :  { %495 = vrot.lane.b32.xlu2 %v489_v39, %s822_s1 }
  0x4c   :  { %354 = vmatpush.bf16.msra.mxu0 %v904_v16 }
  0x4d   :  { %367 = vmatpush.bf16.msra.mxu1 %v909_v17 }
  0x50   :  { %355 = vmatpush.bf16.msra.mxu0 %v918_v18 }
  0x51   :  { %368 = vmatpush.bf16.msra.mxu1 %v923_v19 }
  0x53   :  { %445 = vrot.lane.b32.xlu2 %v439_v36, %s823_s8 }
  0x54   :  { %356 = vmatpush.bf16.msra.mxu0 %v935_v23 }
  0x55   :  { %369 = vmatpush.bf16.msra.mxu1 %v940_v24 }
  0x58   :  { %357 = vmatpush.bf16.msra.mxu0 %v949_v25 }
  0x59   :  { %370 = vmatpush.bf16.msra.mxu1 %v954_v26 }
  0x5c   :  { %358 = vmatpush.bf16.msra.mxu0 %v967_v30 }
  0x5d   :  { %371 = vmatpush.bf16.msra.mxu1 %v972_v31 }
  0x60   :  { %359 = vmatpush.bf16.msra.mxu0 %v981_v32 }
  0x61   :  { %372 = vmatpush.bf16.msra.mxu1 %v986_v33 }
  0x7d   :  { %v294_v41 = vpop.permute.xlu2 %293 }
  0x84   :  { %v192_v40 = vpop.permute.xlu0 %191  ;;  %v196_v42 = vpop.permute.xlu1 %195 }
  0x85   :  { %v296_v46 = vpop.permute.xlu2 %295 }
  0x86   :  { %v299_v52 = vsel %vm297_vm1, %v294_v41, %v296_v46 }
  0x8c   :  { %v194_v43 = vpop.permute.xlu0 %193 }
  0x8d   :  { %v198_v44 = vsel %vm197_vm0, %v192_v40, %v194_v43  ;;  %v199_v45 = vsel %vm197_vm0, %v194_v43, %v196_v42  ;;  %v246_v48 = vpop.permute.xlu2 %245 }
  0x8e   :  { %210 = vmatmul.bf16.vlgmr.msra.gmra.mxu2 %v198_v44  ;;  %223 = vmatmul.bf16.vlgmr.msra.gmra.mxu3 %v199_v45 }
  0x8f   :  { %402 = vmatpush.bf16.msra.mxu2 %v874_v9  ;;  %415 = vmatpush.bf16.msra.mxu3 %v879_v10 }
  0x93   :  { %403 = vmatpush.bf16.msra.mxu2 %v891_v14  ;;  %416 = vmatpush.bf16.msra.mxu3 %v896_v15 }
  0x94   :  { %v292_v47 = vpop.permute.xlu1 %291  ;;  %v242_v49 = vpop.permute.xlu0 %241 }
  0x95   :  { %v298_v51 = vsel %vm297_vm1, %v292_v47, %v294_v41  ;;  %v396_v55 = vpop.permute.xlu2 %395 }
  0x97   :  { %404 = vmatpush.bf16.msra.mxu2 %v904_v16  ;;  %417 = vmatpush.bf16.msra.mxu3 %v909_v17 }
  0x9b   :  { %405 = vmatpush.bf16.msra.mxu2 %v918_v18  ;;  %418 = vmatpush.bf16.msra.mxu3 %v923_v19 }
  0x9c   :  { %v244_v50 = vpop.permute.xlu1 %243 }
  0x9d   :  { %v248_v53 = vsel %vm247_vm2, %v242_v49, %v244_v50  ;;  %v249_v54 = vsel %vm247_vm2, %v244_v50, %v246_v48  ;;  %v346_v58 = vpop.permute.xlu2 %345 }
  0x9e   :  { %260 = vmatmul.bf16.vlgmr.msrb.gmra.mxu0 %v248_v53  ;;  %273 = vmatmul.bf16.vlgmr.msrb.gmra.mxu1 %v249_v54 }
  0x9f   :  { %310 = vmatmul.bf16.vlgmr.msrb.gmra.mxu2 %v298_v51  ;;  %323 = vmatmul.bf16.vlgmr.msrb.gmra.mxu3 %v299_v52 }
  0xa0   :  { %406 = vmatpush.bf16.msra.mxu2 %v935_v23  ;;  %419 = vmatpush.bf16.msra.mxu3 %v940_v24 }
  0xa1   :  { %452 = vmatpush.bf16.msrb.mxu0 %v874_v9  ;;  %465 = vmatpush.bf16.msrb.mxu1 %v879_v10 }
  0xa4   :  { %407 = vmatpush.bf16.msra.mxu2 %v949_v25  ;;  %420 = vmatpush.bf16.msra.mxu3 %v954_v26  ;;  %v394_v56 = vpop.permute.xlu1 %393  ;;  %v392_v57 = vpop.permute.xlu0 %391 }
  0xa5   :  { %453 = vmatpush.bf16.msrb.mxu0 %v891_v14  ;;  %466 = vmatpush.bf16.msrb.mxu1 %v896_v15  ;;  %v399_v59 = vsel %vm397_vm3, %v394_v56, %v396_v55  ;;  %v398_v60 = vsel %vm397_vm3, %v392_v57, %v394_v56  ;;  %v496_v1 = vpop.permute.xlu2 %495  ;;  %v774_v55 = vld [vmem:[%s1146_s3 + $0x38] sm:$0xff] }
  0xa8   :  { %408 = vmatpush.bf16.msra.mxu2 %v967_v30  ;;  %421 = vmatpush.bf16.msra.mxu3 %v972_v31 }
  0xa9   :  { %467 = vmatpush.bf16.msrb.mxu1 %v909_v17  ;;  %454 = vmatpush.bf16.msrb.mxu0 %v904_v16 }
  0xac   :  { %409 = vmatpush.bf16.msra.mxu2 %v981_v32  ;;  %422 = vmatpush.bf16.msra.mxu3 %v986_v33  ;;  %v344_v61 = vpop.permute.xlu1 %343  ;;  %v342_v62 = vpop.permute.xlu0 %341 }
  0xad   :  { %v349_v63 = vsel %vm347_vm4, %v344_v61, %v346_v58  ;;  %v348_v0 = vsel %vm347_vm4, %v342_v62, %v344_v61  ;;  %455 = vmatpush.bf16.msrb.mxu0 %v918_v18  ;;  %468 = vmatpush.bf16.msrb.mxu1 %v923_v19  ;;  %v446_v4 = vpop.permute.xlu2 %445  ;;  %v773_v58 = vld [vmem:[%s1146_s3 + $0x30] sm:$0xff]  ;;  %v770_v61 = vld [vmem:[%s1146_s3 + $0x18] sm:$0xff] }
  0xae   :  { %360 = vmatmul.bf16.vlgmr.msra.gmra.mxu0 %v348_v0  ;;  %373 = vmatmul.bf16.vlgmr.msra.gmra.mxu1 %v349_v63  ;;  %v769_v62 = vld [vmem:[%s1146_s3 + $0x10] sm:$0xff]  ;;  %v768_v63 = vld [vmem:[%s1146_s3 + $0x8] sm:$0xff]  ;;  %v767_v0 = vld [vmem:[%s1146_s3] sm:$0xff] }
  0xaf   :  { %410 = vmatmul.bf16.vlgmr.msra.gmra.mxu2 %v398_v60  ;;  %423 = vmatmul.bf16.vlgmr.msra.gmra.mxu3 %v399_v59  ;;  %v772_v59 = vld [vmem:[%s1146_s3 + $0x28] sm:$0xff]  ;;  %v771_v60 = vld [vmem:[%s1146_s3 + $0x20] sm:$0xff] }
  0xb0   :  { %502 = vmatpush.bf16.msrb.mxu2 %v874_v9  ;;  %515 = vmatpush.bf16.msrb.mxu3 %v879_v10  ;;  %v165_v9 = vpop.f32.mrf.mxu0  ;;  %v178_v10 = vpop.f32.mrf.mxu1 }
  0xb1   :  { %456 = vmatpush.bf16.msrb.mxu0 %v935_v23  ;;  %469 = vmatpush.bf16.msrb.mxu1 %v940_v24  ;;  %v179_v11 = vadd.f32 %v178_v10, %v165_v9 }
  0xb3   :  { %183 = vst.msk [vmem:[#allocation2] sm:$0x3] %vm182_vm6, %v179_v11 }
  0xb4   :  { %503 = vmatpush.bf16.msrb.mxu2 %v891_v14  ;;  %516 = vmatpush.bf16.msrb.mxu3 %v896_v15  ;;  %v494_v2 = vpop.permute.xlu1 %493  ;;  %v492_v3 = vpop.permute.xlu0 %491 }
  0xb5   :  { %457 = vmatpush.bf16.msrb.mxu0 %v949_v25  ;;  %470 = vmatpush.bf16.msrb.mxu1 %v954_v26  ;;  %v499_v12 = vsel %vm497_vm7, %v494_v2, %v496_v1  ;;  %v498_v13 = vsel %vm497_vm7, %v492_v3, %v494_v2  ;;  %v783_v2 = vld [vmem:[%s1145_s2] ss:$0 sm:$0xff] }
  0xb8   :  { %504 = vmatpush.bf16.msrb.mxu2 %v904_v16  ;;  %517 = vmatpush.bf16.msrb.mxu3 %v909_v17  ;;  %v167_v14 = vpop.f32.mrf.mxu0  ;;  %v180_v15 = vpop.f32.mrf.mxu1 }
  0xb9   :  { %458 = vmatpush.bf16.msrb.mxu0 %v967_v30  ;;  %471 = vmatpush.bf16.msrb.mxu1 %v972_v31 }
  0xbc   :  { %505 = vmatpush.bf16.msrb.mxu2 %v918_v18  ;;  %518 = vmatpush.bf16.msrb.mxu3 %v923_v19  ;;  %v444_v5 = vpop.permute.xlu1 %443  ;;  %v442_v6 = vpop.permute.xlu0 %441 }
  0xbd   :  { %459 = vmatpush.bf16.msrb.mxu0 %v981_v32  ;;  %472 = vmatpush.bf16.msrb.mxu1 %v986_v33  ;;  %v449_v7 = vsel %vm447_vm5, %v444_v5, %v446_v4  ;;  %v448_v8 = vsel %vm447_vm5, %v442_v6, %v444_v5 }
  0xc0   :  { %506 = vmatpush.bf16.msrb.mxu2 %v935_v23  ;;  %519 = vmatpush.bf16.msrb.mxu3 %v940_v24 }
  0xc1   :  { %460 = vmatmul.bf16.vlgmr.msrb.gmra.mxu0 %v448_v8  ;;  %473 = vmatmul.bf16.vlgmr.msrb.gmra.mxu1 %v449_v7 }
  0xc2   :  { %624 = vmatpush.bf16.msra.mxu0 %v774_v55 }
  0xc4   :  { %507 = vmatpush.bf16.msrb.mxu2 %v949_v25  ;;  %520 = vmatpush.bf16.msrb.mxu3 %v954_v26 }
  0xc6   :  { %625 = vmatpush.bf16.msra.mxu0 %v773_v58 }
  0xc8   :  { %508 = vmatpush.bf16.msrb.mxu2 %v967_v30  ;;  %521 = vmatpush.bf16.msrb.mxu3 %v972_v31 }
  0xca   :  { %626 = vmatpush.bf16.msra.mxu0 %v772_v59 }
  0xcc   :  { %509 = vmatpush.bf16.msrb.mxu2 %v981_v32  ;;  %522 = vmatpush.bf16.msrb.mxu3 %v986_v33 }
  0xce   :  { %627 = vmatpush.bf16.msra.mxu0 %v771_v60 }
  0xcf   :  { %510 = vmatmul.bf16.vlgmr.msrb.gmra.mxu2 %v498_v13  ;;  %523 = vmatmul.bf16.vlgmr.msrb.gmra.mxu3 %v499_v12 }
  0xd2   :  { %628 = vmatpush.bf16.msra.mxu0 %v770_v61 }
  0xd6   :  { %629 = vmatpush.bf16.msra.mxu0 %v769_v62 }
  0xda   :  { %630 = vmatpush.bf16.msra.mxu0 %v768_v63 }
  0xde   :  { %631 = vmatpush.bf16.msra.mxu0 %v767_v0 }
 0x111   :  { %v211_v16 = vpop.f32.mrf.mxu2  ;;  %v224_v17 = vpop.f32.mrf.mxu3 }
 0x112   :  { %v225_v18 = vadd.f32 %v224_v17, %v211_v16 }
 0x114   :  { %229 = vrot.lane.b32.xlu0 %v225_v18, %s822_s1 }
 0x119   :  { %v213_v19 = vpop.f32.mrf.mxu2  ;;  %v226_v20 = vpop.f32.mrf.mxu3 }
 0x11a   :  { %v784_v20 = vld [vmem:[%s1147_s4] ss:$0 sm:$0xff] }
 0x11b   :  { %v261_v21 = vpop.f32.mrf.mxu0  ;;  %v274_v22 = vpop.f32.mrf.mxu1 }
 0x11c   :  { %v275_v23 = vadd.f32 %v274_v22, %v261_v21 }
 0x11e   :  { %279 = vrot.lane.b32.xlu1 %v275_v23, %s823_s8 }
 0x122   :  { %v311_v24 = vpop.f32.mrf.mxu2  ;;  %v324_v25 = vpop.f32.mrf.mxu3 }
 0x123   :  { %v325_v26 = vadd.f32 %v324_v25, %v311_v24  ;;  %v263_v27 = vpop.f32.mrf.mxu0  ;;  %v276_v28 = vpop.f32.mrf.mxu1 }
 0x125   :  { %329 = vrot.lane.b32.xlu2 %v325_v26, %s820_s21 }
 0x12a   :  { %v313_v29 = vpop.f32.mrf.mxu2  ;;  %v326_v30 = vpop.f32.mrf.mxu3 }
 0x12b   :  { %v361_v31 = vpop.f32.mrf.mxu0  ;;  %v374_v32 = vpop.f32.mrf.mxu1 }
 0x12c   :  { %v375_v33 = vadd.f32 %v374_v32, %v361_v31 }
 0x12e   :  { %379 = vrot.lane.b32.xlu0 %v375_v33, %s821_s7 }
 0x132   :  { %v411_v34 = vpop.f32.mrf.mxu2  ;;  %v424_v35 = vpop.f32.mrf.mxu3 }
 0x133   :  { %v425_v36 = vadd.f32 %v424_v35, %v411_v34  ;;  %v376_v37 = vpop.f32.mrf.mxu1  ;;  %v363_v38 = vpop.f32.mrf.mxu0 }
 0x135   :  { %429 = vrot.lane.b32.xlu1 %v425_v36, %s818_s24 }
 0x13a   :  { %v413_v39 = vpop.f32.mrf.mxu2  ;;  %v426_v40 = vpop.f32.mrf.mxu3 }
 0x13e   :  { %v461_v41 = vpop.f32.mrf.mxu0  ;;  %v474_v42 = vpop.f32.mrf.mxu1 }
 0x13f   :  { %v475_v43 = vadd.f32 %v474_v42, %v461_v41 }
 0x141   :  { %479 = vrot.lane.b32.xlu2 %v475_v43, %s819_s25 }
 0x146   :  { %v463_v44 = vpop.f32.mrf.mxu0  ;;  %v476_v45 = vpop.f32.mrf.mxu1 }
 0x152   :  { %v511_v46 = vpop.f32.mrf.mxu2  ;;  %v524_v47 = vpop.f32.mrf.mxu3 }
 0x153   :  { %v525_v48 = vadd.f32 %v524_v47, %v511_v46 }
 0x155   :  { %529 = vrot.lane.b32.xlu0 %v525_v48, %s817_s20 }
 0x15a   :  { %v513_v49 = vpop.f32.mrf.mxu2  ;;  %v526_v50 = vpop.f32.mrf.mxu3 }
 0x17f   :  { %v330_v53 = vpop.permute.xlu2 %329 }
 0x186   :  { %v230_v51 = vpop.permute.xlu0 %229 }
 0x187   :  { %233 = vst.msk [vmem:[#allocation2] sm:$0x3] %vm232_vm8, %v230_v51 }
 0x190   :  { %v280_v52 = vpop.permute.xlu1 %279 }
 0x191   :  { %283 = vst.msk [vmem:[#allocation2] sm:$0x3] %vm282_vm9, %v280_v52 }
 0x192   :  { %333 = vst.msk [vmem:[#allocation2] sm:$0x3] %vm332_vm10, %v330_v53 }
 0x19b   :  { %v480_v56 = vpop.permute.xlu2 %479 }
 0x1a0   :  { %v380_v54 = vpop.permute.xlu0 %379 }
 0x1a1   :  { %383 = vst.msk [vmem:[#allocation2] sm:$0x3] %vm382_vm11, %v380_v54 }
 0x1a7   :  { %v430_v57 = vpop.permute.xlu1 %429 }
 0x1a8   :  { %433 = vst.msk [vmem:[#allocation2] sm:$0x3] %vm432_vm12, %v430_v57 }
 0x1a9   :  { %483 = vst.msk [vmem:[#allocation2] sm:$0x3] %vm482_vm13, %v480_v56 }
 0x1c7   :  { %v530_v1 = vpop.permute.xlu0 %529 }
 0x1c8   :  { %533 = vst.msk [vmem:[#allocation2] sm:$0x3] %vm532_vm14, %v530_v1 }
 0x1cf   :  { %v534_v3 = vld [vmem:[#allocation2] sm:$0x3] }
 0x1d0   :  { %v539_v4 = vadd.f32 %v783_v2, %v534_v3 }
 0x1d2   :  { %v541_v5 = vand.u32 2147483647, %v539_v4  ;;  %v540_v16 = vmax.f32 %v539_v4, 0.0 }
 0x1d4   :  { %v542_v6 = vsub.f32 0.0, %v541_v5 }
 0x1d6   :  { %v543_v7 = vmul.f32 1.442695, %v542_v6 }
 0x1d8   :  { %785 = vpow2.f32 %v543_v7 }
 0x1de   :  { %v786_v8 = vpop.eup %785 }
 0x1df   :  { %v545_v9 = vadd.f32 1.0, %v786_v8  ;;  %v548_v10 = vmul.f32 -0.5, %v786_v8  ;;  %v551_v12 = vand.u32 2147483647, %v786_v8 }
 0x1e1   :  { %787 = vlog2.f32 %v545_v9  ;;  %v549_v11 = vadd.f32 1.0, %v548_v10  ;;  %vm552_vm15 = vcmp.lt.f32.partialorder %v551_v12, 0.0004427343 }
 0x1e3   :  { %v550_v15 = vmul.f32 %v786_v8, %v549_v11 }
 0x1e7   :  { %v788_v13 = vpop.eup %787 }
 0x1e8   :  { %v547_v14 = vmul.f32 0.6931472, %v788_v13 }
 0x1ea   :  { %v553_v17 = vsel %vm552_vm15, %v550_v15, %v547_v14 }
 0x1eb   :  { %v554_v18 = vadd.f32 %v553_v17, %v540_v16 }
 0x1ed   :  { %v555_v19 = vpack.c.bf16 %v554_v18, %v554_v18 }
 0x1ef   :  { %632 = vmatmul.bf16.vlgmr.msra.gmra.mxu0 %v555_v19 }
 0x26c   :  { %v633_v21 = vpop.f32.mrf.mxu0 }
 0x26d   :  { %v634_v22 = vadd.f32 %v784_v20, %v633_v21 }
 0x26f   :  { %789 = vtanh.f32 %v634_v22 }
 0x274   :  { %v635_v23 = vpop.f32.mrf.mxu0 }
 0x275   :  { %v790_v24 = vpop.eup %789 }
 0x276   :  { %638 = vst [vmem:[#allocation3] sm:$0x3] %v790_v24 }
 0x277   :  { %649 = dma.vmem_to_hbm [thread:$0]  %s645_s27, 32, %s647_s30, [#allocation4]  }
 0x278   :  { %815 = dma.done.wait [#allocation4], 32  }
 0x279   :  { %816 = vsyncadd [#allocation4], 4294967264 }
 0x27a   :  { %654 = vsyncpa [#allocation4], 1 }

</bundles_post_ra>
